<compile_context>
chip_gen: v5e
topology: v5e:2x2
jax: 0.10.0
libtpu: 0.0.40
codegen_flags: <defaults>
</compile_context>

<pallas_src>
import jax
import jax.numpy as jnp
from jax.experimental import pallas as pl
from jax.experimental.pallas import tpu as pltpu


# ---------------------------------------------------------------------------
# Kernel: fused 3-matmul MLP block (BN already folded into W1/W2 and c1/c2)
# ---------------------------------------------------------------------------
def mlp_kernel(x_ref, w1_ref, c1_ref, w2_ref, c2_ref, w3_ref, b3_ref, o_ref):
    x = x_ref[...]

    # layer_1 (+ folded batchnorm1) + relu
    h1 = jnp.dot(x, w1_ref[...], preferred_element_type=jnp.float32) + c1_ref[...]
    h1 = jnp.maximum(h1, 0.0).astype(w2_ref.dtype)

    # layer_2 (+ folded batchnorm2) + relu
    h2 = jnp.dot(h1, w2_ref[...], preferred_element_type=jnp.float32) + c2_ref[...]
    h2 = jnp.maximum(h2, 0.0).astype(w3_ref.dtype)

    # dropout (eval mode -> identity), then layer_out
    # TODO(synk): training-mode dropout (pltpu.prng_seed + prng_random_bits mask) and
    #             training-mode (batch-statistics) BatchNorm are not implemented.
    out = jnp.dot(h2, w3_ref[...], preferred_element_type=jnp.float32) + b3_ref[...]
    o_ref[...] = out.astype(o_ref.dtype)


# ---------------------------------------------------------------------------
# Wrapper
# ---------------------------------------------------------------------------
def _round_up(x, m):
    return ((x + m - 1) // m) * m


_CONST_IDX = lambda i: (0, 0)     # index map for grid-invariant operands
_single_buffer_ok = True          # flipped off if this jax build rejects Buffered(1)


def _const_spec(block_shape, single_buffer):
    """BlockSpec for an operand whose block never changes across the grid.

    pipeline_mode=pl.Buffered(1) drops the useless second VMEM buffer + pipeline
    bookkeeping for these constants; fall back to the default spec if unsupported.
    """
    if single_buffer and hasattr(pl, "Buffered"):
        try:
            return pl.BlockSpec(block_shape, _CONST_IDX, pipeline_mode=pl.Buffered(1))
        except TypeError:  # older jax: BlockSpec has no pipeline_mode kwarg
            pass
    return pl.BlockSpec(block_shape, _CONST_IDX)


def mlp_forward(x, params, *, tb=None, compute_dtype=jnp.float32):
    """Eval-mode forward.  x: (B, n_features) float32.

    compute_dtype=jnp.bfloat16 is the recommended perf setting on v5e/v6e/v7x
    (halves streamed activation/weight HBM traffic, MXU-native); it introduces
    ~1e-2 level error on the logits, so it is opt-in rather than the default.
    """
    global _single_buffer_ok

    B, F = x.shape
    H1 = params["w1"].shape[1]
    H2 = params["w2"].shape[1]
    C = params["w3"].shape[1]
    eps = 1e-5

    # ---- Fold BatchNorm (eval, running stats) into the preceding Linear --------------
    s1 = params["bn1_gamma"] / jnp.sqrt(params["bn1_var"] + eps)
    c1 = (params["b1"] - params["bn1_mean"]) * s1 + params["bn1_beta"]
    w1 = params["w1"] * s1[None, :]

    s2 = params["bn2_gamma"] / jnp.sqrt(params["bn2_var"] + eps)
    c2 = (params["b2"] - params["bn2_mean"]) * s2 + params["bn2_beta"]
    w2 = params["w2"] * s2[None, :]

    w3 = params["w3"]
    b3 = params["b3"]

    c1 = c1.reshape(1, H1).astype(jnp.float32)
    c2 = c2.reshape(1, H2).astype(jnp.float32)
    b3 = b3.reshape(1, C).astype(jnp.float32)

    # Optional bf16 matmul inputs; accumulation / epilogue stay f32.
    x = x.astype(compute_dtype)
    w1 = w1.astype(compute_dtype)
    w2 = w2.astype(compute_dtype)
    w3 = w3.astype(compute_dtype)
    in_bytes = jnp.dtype(compute_dtype).itemsize

    # ---- Batch tiling (no padding; ragged last block handled by Pallas) --------------
    #  * tiny B: single grid step (no pipeline to prime).
    #  * larger B: >= 2 grid steps, even count where possible (v7x megacore balance),
    #    tiles up to 2048 rows to amortize per-step pipeline overhead.
    if tb is None:
        if B <= 256:
            tb = B
        else:
            steps = max(2, pl.cdiv(B, 2048))
            steps += steps % 2                       # even step count for 2-TC chips
            tb = min(2048, _round_up(pl.cdiv(B, steps), 16))
    grid = (pl.cdiv(B, tb),)

    # ---- Advisory cost estimate (helps XLA schedule around the custom call) ----------
    flops = 2 * B * (F * H1 + H1 * H2 + H2 * C)
    bytes_accessed = (B * F * in_bytes                            # streamed activations
                      + (F * H1 + H1 * H2 + H2 * C) * in_bytes    # weights
                      + (H1 + H2 + C) * 4                         # fused biases
                      + B * C * 4)                                # output
    cost = pl.CostEstimate(flops=flops, transcendentals=0,
                           bytes_accessed=bytes_accessed)

    # ---- VMEM budget: only set explicitly when the 32 MiB default would be tight -----
    # TODO(synk): if F can be very large (>~8k), K-tile W1 over a third grid axis with an
    #             f32 accumulator (pl.when init/finalize) instead of one (F, H1) block.
    vmem_est = (2 * tb * (F * in_bytes + C * 4)                   # pipelined x / out tiles
                + 2 * (F * H1 + H1 * H2 + H2 * C) * in_bytes      # weights (<= 2 buffers)
                + 2 * (H1 + H2 + C) * 4                           # biases
                + 4 * tb * (H1 + H2))                             # f32 intermediates
    compiler_kwargs = {}
    if vmem_est > 32 * 1024 * 1024:
        compiler_kwargs["vmem_limit_bytes"] = int(min(vmem_est * 5 // 4,
                                                      64 * 1024 * 1024))

    def build(single_buffer):
        return pl.pallas_call(
            mlp_kernel,
            out_shape=jax.ShapeDtypeStruct((B, C), jnp.float32),
            grid_spec=pltpu.PrefetchScalarGridSpec(
                num_scalar_prefetch=0,
                grid=grid,
                in_specs=[
                    pl.BlockSpec((tb, F), lambda i: (i, 0)),      # x tile over batch
                    _const_spec((F, H1), single_buffer),          # W1 (BN folded)
                    _const_spec((1, H1), single_buffer),          # fused bias/shift 1
                    _const_spec((H1, H2), single_buffer),         # W2 (BN folded)
                    _const_spec((1, H2), single_buffer),          # fused bias/shift 2
                    _const_spec((H2, C), single_buffer),          # W3
                    _const_spec((1, C), single_buffer),           # b3
                ],
                # Unpadded (tb, C) output: narrow masked store for tiny C, but no padded
                # writeback and no wrapper-side slice pass.
                out_specs=pl.BlockSpec((tb, C), lambda i: (i, 0)),
            ),
            compiler_params=pltpu.CompilerParams(
                dimension_semantics=("parallel",), **compiler_kwargs),
            cost_estimate=cost,
        )

    args = (x, w1, c1, w2, c2, w3, b3)
    if _single_buffer_ok:
        try:
            return build(True)(*args)
        except Exception:
            # Older jax build rejected single-buffered constants; use the previously
            # validated default (double-buffered) configuration instead.
            _single_buffer_ok = False
    return build(False)(*args)


# ---------------------------------------------------------------------------
# Deterministic params + pure-JAX reference
# ---------------------------------------------------------------------------
def init_params(key, n_features, n_classes):
    H1, H2 = 256, 128
    ks = jax.random.split(key, 6)

    def linear_init(kw, kb, fan_in, fan_out):
        # Mimics PyTorch Linear default init (uniform +- 1/sqrt(fan_in)).
        bound = 1.0 / jnp.sqrt(fan_in)
        w = jax.random.uniform(kw, (fan_in, fan_out), jnp.float32, -bound, bound)
        b = jax.random.uniform(kb, (fan_out,), jnp.float32, -bound, bound)
        return w, b

    w1, b1 = linear_init(ks[0], ks[1], n_features, H1)
    w2, b2 = linear_init(ks[2], ks[3], H1, H2)
    w3, b3 = linear_init(ks[4], ks[5], H2, n_classes)

    return dict(
        w1=w1, b1=b1,
        w2=w2, b2=b2,
        w3=w3, b3=b3,
        bn1_gamma=jnp.ones((H1,), jnp.float32), bn1_beta=jnp.zeros((H1,), jnp.float32),
        bn1_mean=jnp.zeros((H1,), jnp.float32), bn1_var=jnp.ones((H1,), jnp.float32),
        bn2_gamma=jnp.ones((H2,), jnp.float32), bn2_beta=jnp.zeros((H2,), jnp.float32),
        bn2_mean=jnp.zeros((H2,), jnp.float32), bn2_var=jnp.ones((H2,), jnp.float32),
    )


def reference_forward(x, params):
    eps = 1e-5
    h = x @ params["w1"] + params["b1"]
    h = (h - params["bn1_mean"]) / jnp.sqrt(params["bn1_var"] + eps) \
        * params["bn1_gamma"] + params["bn1_beta"]
    h = jnp.maximum(h, 0.0)
    h = h @ params["w2"] + params["b2"]
    h = (h - params["bn2_mean"]) / jnp.sqrt(params["bn2_var"] + eps) \
        * params["bn2_gamma"] + params["bn2_beta"]
    h = jnp.maximum(h, 0.0)
    return h @ params["w3"] + params["b3"]


if __name__ == "__main__":
    key = jax.random.PRNGKey(0)
    kx, kp, kx2 = jax.random.split(key, 3)

    n_features, n_classes = 32, 8
    params = init_params(kp, n_features, n_classes)

    # 1) Tiny batch: single grid step (full-dim blocks).
    x = jax.random.normal(kx, (8, n_features), jnp.float32)
    out = jax.block_until_ready(mlp_forward(x, params))
    ref = reference_forward(x, params)
    assert out.shape == (8, n_classes)
    assert jnp.allclose(out, ref, atol=1e-4, rtol=1e-4)

    # 2) Larger batch, not a multiple of the tile: 2 parallel grid steps (v7x megacore)
    #    with a ragged, masked last block — no wrapper pad/slice anywhere.
    x2 = jax.random.normal(kx2, (300, n_features), jnp.float32)
    out2 = jax.block_until_ready(mlp_forward(x2, params))
    ref2 = reference_forward(x2, params)
    assert out2.shape == (300, n_classes)
    assert jnp.allclose(out2, ref2, atol=1e-4, rtol=1e-4)

    # 3) bf16 streaming path (recommended perf setting): looser tolerance vs f32 ref.
    out3 = jax.block_until_ready(mlp_forward(x2, params, compute_dtype=jnp.bfloat16))
    assert out3.shape == (300, n_classes)
    assert jnp.allclose(out3, ref2, atol=1e-1, rtol=1e-1)

    print("KERNEL_OK")
</pallas_src>

<mosaic_0001>
module attributes {stable_mosaic.version = 11 : i64} {
  func.func @mlp_kernel(%arg0: i32, %arg1: memref<8x32xf32, #tpu.memory_space<vmem>>, %arg2: memref<32x256xf32, #tpu.memory_space<vmem>>, %arg3: memref<1x256xf32, #tpu.memory_space<vmem>>, %arg4: memref<256x128xf32, #tpu.memory_space<vmem>>, %arg5: memref<1x128xf32, #tpu.memory_space<vmem>>, %arg6: memref<128x8xf32, #tpu.memory_space<vmem>>, %arg7: memref<1x8xf32, #tpu.memory_space<vmem>>, %arg8: memref<8x8xf32, #tpu.memory_space<vmem>>) attributes {dimension_semantics = [#tpu.dimension_semantics<parallel>], iteration_bounds = array<i64: 1>, scalar_prefetch = 0 : i64, scratch_operands = 0 : i64, tpu.core_type = #tpu.core_type<tc>, window_params = [{transform_indices = @transform_0, window_bounds = array<i64: 8, 32>}, {pipeline_mode = #tpu.pipeline_mode<synchronous>, transform_indices = @transform_1, window_bounds = array<i64: 32, 256>}, {pipeline_mode = #tpu.pipeline_mode<synchronous>, transform_indices = @transform_2, window_bounds = array<i64: 1, 256>}, {pipeline_mode = #tpu.pipeline_mode<synchronous>, transform_indices = @transform_3, window_bounds = array<i64: 256, 128>}, {pipeline_mode = #tpu.pipeline_mode<synchronous>, transform_indices = @transform_4, window_bounds = array<i64: 1, 128>}, {pipeline_mode = #tpu.pipeline_mode<synchronous>, transform_indices = @transform_5, window_bounds = array<i64: 128, 8>}, {pipeline_mode = #tpu.pipeline_mode<synchronous>, transform_indices = @transform_6, window_bounds = array<i64: 1, 8>}, {transform_indices = @transform_7, window_bounds = array<i64: 8, 8>}]} {
    %c0 = arith.constant 0 : index
    %c0_0 = arith.constant 0 : index
    %0 = vector.load %arg1[%c0, %c0_0] : memref<8x32xf32, #tpu.memory_space<vmem>>, vector<8x32xf32>
    %c0_1 = arith.constant 0 : index
    %c0_2 = arith.constant 0 : index
    %1 = vector.load %arg2[%c0_1, %c0_2] : memref<32x256xf32, #tpu.memory_space<vmem>>, vector<32x256xf32>
    %cst = arith.constant dense<0.000000e+00> : vector<8x256xf32>
    %2 = tpu.matmul %0, %1, %cst {dimension_numbers = #tpu.dot_dimension_numbers<[1], [0], [0], [1], [0, 0, 1, 1], [], []>} : vector<8x32xf32>, vector<32x256xf32>, vector<8x256xf32> -> vector<8x256xf32>
    %c0_3 = arith.constant 0 : index
    %c0_4 = arith.constant 0 : index
    %3 = vector.load %arg3[%c0_3, %c0_4] : memref<1x256xf32, #tpu.memory_space<vmem>>, vector<1x256xf32>
    %4 = vector.broadcast %3 : vector<1x256xf32> to vector<8x256xf32>
    %5 = arith.addf %2, %4 : vector<8x256xf32>
    %cst_5 = arith.constant 0.000000e+00 : f32
    %6 = vector.broadcast %cst_5 : f32 to vector<8x256xf32>
    %7 = arith.maximumf %5, %6 : vector<8x256xf32>
    %c0_6 = arith.constant 0 : index
    %c0_7 = arith.constant 0 : index
    %8 = vector.load %arg4[%c0_6, %c0_7] : memref<256x128xf32, #tpu.memory_space<vmem>>, vector<256x128xf32>
    %cst_8 = arith.constant dense<0.000000e+00> : vector<8x128xf32>
    %9 = tpu.matmul %7, %8, %cst_8 {dimension_numbers = #tpu.dot_dimension_numbers<[1], [0], [0], [1], [0, 0, 1, 1], [], []>} : vector<8x256xf32>, vector<256x128xf32>, vector<8x128xf32> -> vector<8x128xf32>
    %c0_9 = arith.constant 0 : index
    %c0_10 = arith.constant 0 : index
    %10 = vector.load %arg5[%c0_9, %c0_10] : memref<1x128xf32, #tpu.memory_space<vmem>>, vector<1x128xf32>
    %11 = vector.broadcast %10 : vector<1x128xf32> to vector<8x128xf32>
    %12 = arith.addf %9, %11 : vector<8x128xf32>
    %cst_11 = arith.constant 0.000000e+00 : f32
    %13 = vector.broadcast %cst_11 : f32 to vector<8x128xf32>
    %14 = arith.maximumf %12, %13 : vector<8x128xf32>
    %c0_12 = arith.constant 0 : index
    %c0_13 = arith.constant 0 : index
    %15 = vector.load %arg6[%c0_12, %c0_13] : memref<128x8xf32, #tpu.memory_space<vmem>>, vector<128x8xf32>
    %cst_14 = arith.constant dense<0.000000e+00> : vector<8x8xf32>
    %16 = tpu.matmul %14, %15, %cst_14 {dimension_numbers = #tpu.dot_dimension_numbers<[1], [0], [0], [1], [0, 0, 1, 1], [], []>} : vector<8x128xf32>, vector<128x8xf32>, vector<8x8xf32> -> vector<8x8xf32>
    %c0_15 = arith.constant 0 : index
    %c0_16 = arith.constant 0 : index
    %17 = vector.load %arg7[%c0_15, %c0_16] : memref<1x8xf32, #tpu.memory_space<vmem>>, vector<1x8xf32>
    %18 = vector.broadcast %17 : vector<1x8xf32> to vector<8x8xf32>
    %19 = arith.addf %16, %18 : vector<8x8xf32>
    %c0_17 = arith.constant 0 : index
    %c0_18 = arith.constant 0 : index
    %20 = vector.load %arg8[%c0_17, %c0_18] : memref<8x8xf32, #tpu.memory_space<vmem>>, vector<8x8xf32>
    tpu.vector_store %arg8[%c0_17, %c0_18], %19 {strides = array<i32>} : memref<8x8xf32, #tpu.memory_space<vmem>>, vector<8x8xf32>,
    return
  }
  func.func @transform_0(%arg0: i32) -> (i32, i32) {
    %c0_i32 = arith.constant 0 : i32
    %c0_i32_0 = arith.constant 0 : i32
    return %arg0, %c0_i32 : i32, i32
  }
  func.func @transform_1(%arg0: i32) -> (i32, i32) {
    %c0_i32 = arith.constant 0 : i32
    %c0_i32_0 = arith.constant 0 : i32
    %c0_i32_1 = arith.constant 0 : i32
    return %c0_i32, %c0_i32_0 : i32, i32
  }
  func.func @transform_2(%arg0: i32) -> (i32, i32) {
    %c0_i32 = arith.constant 0 : i32
    %c0_i32_0 = arith.constant 0 : i32
    %c0_i32_1 = arith.constant 0 : i32
    return %c0_i32, %c0_i32_0 : i32, i32
  }
  func.func @transform_3(%arg0: i32) -> (i32, i32) {
    %c0_i32 = arith.constant 0 : i32
    %c0_i32_0 = arith.constant 0 : i32
    %c0_i32_1 = arith.constant 0 : i32
    return %c0_i32, %c0_i32_0 : i32, i32
  }
  func.func @transform_4(%arg0: i32) -> (i32, i32) {
    %c0_i32 = arith.constant 0 : i32
    %c0_i32_0 = arith.constant 0 : i32
    %c0_i32_1 = arith.constant 0 : i32
    return %c0_i32, %c0_i32_0 : i32, i32
  }
  func.func @transform_5(%arg0: i32) -> (i32, i32) {
    %c0_i32 = arith.constant 0 : i32
    %c0_i32_0 = arith.constant 0 : i32
    %c0_i32_1 = arith.constant 0 : i32
    return %c0_i32, %c0_i32_0 : i32, i32
  }
  func.func @transform_6(%arg0: i32) -> (i32, i32) {
    %c0_i32 = arith.constant 0 : i32
    %c0_i32_0 = arith.constant 0 : i32
    %c0_i32_1 = arith.constant 0 : i32
    return %c0_i32, %c0_i32_0 : i32, i32
  }
  func.func @transform_7(%arg0: i32) -> (i32, i32) {
    %c0_i32 = arith.constant 0 : i32
    %c0_i32_0 = arith.constant 0 : i32
    return %arg0, %c0_i32 : i32, i32
  }
}

module attributes {stable_mosaic.version = 11 : i64} {
  func.func @mlp_kernel(%arg0: i32, %arg1: memref<8x32xf32, #tpu.memory_space<vmem>>, %arg2: memref<32x256xf32, #tpu.memory_space<vmem>>, %arg3: memref<1x256xf32, #tpu.memory_space<vmem>>, %arg4: memref<256x128xf32, #tpu.memory_space<vmem>>, %arg5: memref<1x128xf32, #tpu.memory_space<vmem>>, %arg6: memref<128x8xf32, #tpu.memory_space<vmem>>, %arg7: memref<1x8xf32, #tpu.memory_space<vmem>>, %arg8: memref<8x8xf32, #tpu.memory_space<vmem>>) attributes {dimension_semantics = [#tpu.dimension_semantics<parallel>], iteration_bounds = array<i64: 1>, scalar_prefetch = 0 : i64, scratch_operands = 0 : i64, tpu.core_type = #tpu.core_type<tc>, window_params = [{transform_indices = @transform_0, window_bounds = array<i64: 8, 32>}, {pipeline_mode = #tpu.pipeline_mode<synchronous>, transform_indices = @transform_1, window_bounds = array<i64: 32, 256>}, {pipeline_mode = #tpu.pipeline_mode<synchronous>, transform_indices = @transform_2, window_bounds = array<i64: 1, 256>}, {pipeline_mode = #tpu.pipeline_mode<synchronous>, transform_indices = @transform_3, window_bounds = array<i64: 256, 128>}, {pipeline_mode = #tpu.pipeline_mode<synchronous>, transform_indices = @transform_4, window_bounds = array<i64: 1, 128>}, {pipeline_mode = #tpu.pipeline_mode<synchronous>, transform_indices = @transform_5, window_bounds = array<i64: 128, 8>}, {pipeline_mode = #tpu.pipeline_mode<synchronous>, transform_indices = @transform_6, window_bounds = array<i64: 1, 8>}, {transform_indices = @transform_7, window_bounds = array<i64: 8, 8>}]} {
    %c0 = arith.constant 0 : index
    %c0_0 = arith.constant 0 : index
    %0 = vector.load %arg1[%c0, %c0_0] : memref<8x32xf32, #tpu.memory_space<vmem>>, vector<8x32xf32>
    %c0_1 = arith.constant 0 : index
    %c0_2 = arith.constant 0 : index
    %1 = vector.load %arg2[%c0_1, %c0_2] : memref<32x256xf32, #tpu.memory_space<vmem>>, vector<32x256xf32>
    %cst = arith.constant dense<0.000000e+00> : vector<8x256xf32>
    %2 = tpu.matmul %0, %1, %cst {dimension_numbers = #tpu.dot_dimension_numbers<[1], [0], [0], [1], [0, 0, 1, 1], [], []>} : vector<8x32xf32>, vector<32x256xf32>, vector<8x256xf32> -> vector<8x256xf32>
    %c0_3 = arith.constant 0 : index
    %c0_4 = arith.constant 0 : index
    %3 = vector.load %arg3[%c0_3, %c0_4] : memref<1x256xf32, #tpu.memory_space<vmem>>, vector<1x256xf32>
    %4 = vector.broadcast %3 : vector<1x256xf32> to vector<8x256xf32>
    %5 = arith.addf %2, %4 : vector<8x256xf32>
    %cst_5 = arith.constant 0.000000e+00 : f32
    %6 = vector.broadcast %cst_5 : f32 to vector<8x256xf32>
    %7 = arith.maximumf %5, %6 : vector<8x256xf32>
    %c0_6 = arith.constant 0 : index
    %c0_7 = arith.constant 0 : index
    %8 = vector.load %arg4[%c0_6, %c0_7] : memref<256x128xf32, #tpu.memory_space<vmem>>, vector<256x128xf32>
    %cst_8 = arith.constant dense<0.000000e+00> : vector<8x128xf32>
    %9 = tpu.matmul %7, %8, %cst_8 {dimension_numbers = #tpu.dot_dimension_numbers<[1], [0], [0], [1], [0, 0, 1, 1], [], []>} : vector<8x256xf32>, vector<256x128xf32>, vector<8x128xf32> -> vector<8x128xf32>
    %c0_9 = arith.constant 0 : index
    %c0_10 = arith.constant 0 : index
    %10 = vector.load %arg5[%c0_9, %c0_10] : memref<1x128xf32, #tpu.memory_space<vmem>>, vector<1x128xf32>
    %11 = vector.broadcast %10 : vector<1x128xf32> to vector<8x128xf32>
    %12 = arith.addf %9, %11 : vector<8x128xf32>
    %cst_11 = arith.constant 0.000000e+00 : f32
    %13 = vector.broadcast %cst_11 : f32 to vector<8x128xf32>
    %14 = arith.maximumf %12, %13 : vector<8x128xf32>
    %c0_12 = arith.constant 0 : index
    %c0_13 = arith.constant 0 : index
    %15 = vector.load %arg6[%c0_12, %c0_13] : memref<128x8xf32, #tpu.memory_space<vmem>>, vector<128x8xf32>
    %cst_14 = arith.constant dense<0.000000e+00> : vector<8x8xf32>
    %16 = tpu.matmul %14, %15, %cst_14 {dimension_numbers = #tpu.dot_dimension_numbers<[1], [0], [0], [1], [0, 0, 1, 1], [], []>} : vector<8x128xf32>, vector<128x8xf32>, vector<8x8xf32> -> vector<8x8xf32>
    %c0_15 = arith.constant 0 : index
    %c0_16 = arith.constant 0 : index
    %17 = vector.load %arg7[%c0_15, %c0_16] : memref<1x8xf32, #tpu.memory_space<vmem>>, vector<1x8xf32>
    %18 = vector.broadcast %17 : vector<1x8xf32> to vector<8x8xf32>
    %19 = arith.addf %16, %18 : vector<8x8xf32>
    %c0_17 = arith.constant 0 : index
    %c0_18 = arith.constant 0 : index
    %20 = vector.load %arg8[%c0_17, %c0_18] : memref<8x8xf32, #tpu.memory_space<vmem>>, vector<8x8xf32>
    tpu.vector_store %arg8[%c0_17, %c0_18], %19 {strides = array<i32>} : memref<8x8xf32, #tpu.memory_space<vmem>>, vector<8x8xf32>,
    return
  }
  func.func @transform_0(%arg0: i32) -> (i32, i32) {
    %c0_i32 = arith.constant 0 : i32
    %c0_i32_0 = arith.constant 0 : i32
    return %arg0, %c0_i32 : i32, i32
  }
  func.func @transform_1(%arg0: i32) -> (i32, i32) {
    %c0_i32 = arith.constant 0 : i32
    %c0_i32_0 = arith.constant 0 : i32
    %c0_i32_1 = arith.constant 0 : i32
    return %c0_i32, %c0_i32_0 : i32, i32
  }
  func.func @transform_2(%arg0: i32) -> (i32, i32) {
    %c0_i32 = arith.constant 0 : i32
    %c0_i32_0 = arith.constant 0 : i32
    %c0_i32_1 = arith.constant 0 : i32
    return %c0_i32, %c0_i32_0 : i32, i32
  }
  func.func @transform_3(%arg0: i32) -> (i32, i32) {
    %c0_i32 = arith.constant 0 : i32
    %c0_i32_0 = arith.constant 0 : i32
    %c0_i32_1 = arith.constant 0 : i32
    return %c0_i32, %c0_i32_0 : i32, i32
  }
  func.func @transform_4(%arg0: i32) -> (i32, i32) {
    %c0_i32 = arith.constant 0 : i32
    %c0_i32_0 = arith.constant 0 : i32
    %c0_i32_1 = arith.constant 0 : i32
    return %c0_i32, %c0_i32_0 : i32, i32
  }
  func.func @transform_5(%arg0: i32) -> (i32, i32) {
    %c0_i32 = arith.constant 0 : i32
    %c0_i32_0 = arith.constant 0 : i32
    %c0_i32_1 = arith.constant 0 : i32
    return %c0_i32, %c0_i32_0 : i32, i32
  }
  func.func @transform_6(%arg0: i32) -> (i32, i32) {
    %c0_i32 = arith.constant 0 : i32
    %c0_i32_0 = arith.constant 0 : i32
    %c0_i32_1 = arith.constant 0 : i32
    return %c0_i32, %c0_i32_0 : i32, i32
  }
  func.func @transform_7(%arg0: i32) -> (i32, i32) {
    %c0_i32 = arith.constant 0 : i32
    %c0_i32_0 = arith.constant 0 : i32
    return %arg0, %c0_i32 : i32, i32
  }
}

</mosaic_0001>

<bundles_post_ra>
// kernel: tpu_custom_call.1
= control target key start
LH: loop header
LB: loop body
LE: loop exit
PB: predicated region body
PF: predicated region fallthrough
CT: control target
= control target key end

     0   :  { %12 = vsyncpa [#allocation3], 0  ;;  %s436_s0 = inlined_call_operand.vmem [shape: f32[8,32], index: 0, kind: input, shape index: {}]   ;;  %s437_s1 = inlined_call_operand.vmem [shape: f32[32,256], index: 1, kind: input, shape index: {}]   ;;  %s438_s2 = inlined_call_operand.vmem [shape: f32[1,256], index: 2, kind: input, shape index: {}]   ;;  %s439_s3 = inlined_call_operand.hbm [shape: f32[256,128], index: 3, kind: input, shape index: {}]   ;;  %s440_s4 = inlined_call_operand.vmem [shape: f32[1,128], index: 4, kind: input, shape index: {}]   ;;  %s441_s5 = inlined_call_operand.vmem [shape: f32[128,8], index: 5, kind: input, shape index: {}]   ;;  %s442_s6 = inlined_call_operand.vmem [shape: f32[1,8], index: 6, kind: input, shape index: {}]   ;;  %s443_s7 = inlined_call_operand.hbm [shape: f32[8,8], index: 7, kind: output, shape index: {}]  }
   0x1   :  { %13 = vsyncpa [#allocation4], 0  ;;  %s24_s26 = sshll.u32 %s439_s3, 4  ;;  %s300_s27 = smov [#allocation2]   ;;  %s25_s26 = int_to_ptr.hbm [resolvable:$true] %s24_s26 }
   0x2   :  { %s26_s28 = sshll.u32 %s300_s27, 4  ;;  %s301_s29 = smov 128   ;;  %s27_s28 = int_to_ptr.vmem [resolvable:$true] %s26_s28 }
   0x3   :  { %s302_s30 = smov 8  }
   0x4   :  { %32 = dma.hbm_to_vmem [thread:$0]  %s25_s26, 4096, %s27_s28, [#allocation3], %s301_s29, %s301_s29, %s302_s30  }
   0x5   :  { %296 = dma.done.wait [#allocation3], 4096  }
   0x6   :  { %297 = vsyncadd [#allocation3], 4294963200  ;;  %v50_v0 = vld [vmem:[%s437_s1 + $0x30] sm:$0xff]  ;;  %v48_v1 = vld [vmem:[%s437_s1 + $0x20] sm:$0xff]  ;;  %vm58_vm0 = vcmask 261120   ;;  %s303_s11 = smov [#allocation5]  }
   0x7   :  { %74 = vmatpush.msra.mxu1 %v50_v0  ;;  %v46_v2 = vld [vmem:[%s437_s1 + $0x10] sm:$0xff]  ;;  %v119_v3 = vld [vmem:[#allocation2 + $0x78] sm:$0xff]  ;;  %v44_v5 = vld [vmem:[%s437_s1] sm:$0xff]  ;;  %s228_s12 = sshll.u32 %s303_s11, 4  ;;  %vm221_vm1 = vcmask 64512   ;;  %s229_s12 = int_to_ptr.vmem [resolvable:$true] %s228_s12 }
   0x8   :  { %v118_v4 = vld [vmem:[#allocation2 + $0x70] sm:$0xff]  ;;  %140 = vmatpush.msra.mxu2 %v119_v3  ;;  %v135_v6 = vld [vmem:[#allocation2 + $0xf8] sm:$0xff]  ;;  %v43_v7 = vld [vmem:[%s436_s0] sm:$0xff] }
   0x9   :  { %75 = vmatpush.msra.mxu1 %v48_v1  ;;  %v117_v8 = vld [vmem:[#allocation2 + $0x68] sm:$0xff]  ;;  %160 = vmatpush.msra.mxu3 %v135_v6  ;;  %v134_v9 = vld [vmem:[#allocation2 + $0xf0] sm:$0xff]  ;;  %v51_v10 = vld [vmem:[%s437_s1 + $0x38] sm:$0xff] }
   0xa   :  { %141 = vmatpush.msra.mxu2 %v118_v4  ;;  %v133_v11 = vld [vmem:[#allocation2 + $0xe8] sm:$0xff]  ;;  %v116_v12 = vld [vmem:[#allocation2 + $0x60] sm:$0xff]  ;;  %v115_v15 = vld [vmem:[#allocation2 + $0x58] sm:$0xff] }
   0xb   :  { %76 = vmatpush.msra.mxu1 %v46_v2  ;;  %161 = vmatpush.msra.mxu3 %v134_v9  ;;  %v49_v13 = vld [vmem:[%s437_s1 + $0x28] sm:$0xff]  ;;  %v132_v14 = vld [vmem:[#allocation2 + $0xe0] sm:$0xff]  ;;  %v47_v16 = vld [vmem:[%s437_s1 + $0x18] sm:$0xff] }
   0xc   :  { %142 = vmatpush.msra.mxu2 %v117_v8  ;;  %v131_v17 = vld [vmem:[#allocation2 + $0xd8] sm:$0xff]  ;;  %v114_v18 = vld [vmem:[#allocation2 + $0x50] sm:$0xff]  ;;  %v45_v19 = vld [vmem:[%s437_s1 + $0x8] sm:$0xff] }
   0xd   :  { %77 = vmatpush.msra.mxu1 %v44_v5  ;;  %162 = vmatpush.msra.mxu3 %v133_v11  ;;  %v130_v20 = vld [vmem:[#allocation2 + $0xd0] sm:$0xff]  ;;  %v113_v21 = vld [vmem:[#allocation2 + $0x48] sm:$0xff]  ;;  %v112_v23 = vld [vmem:[#allocation2 + $0x40] sm:$0xff] }
   0xe   :  { %240 = vmatmul.msk.f32.vlgmr.msra.gmra.mxu1 %vm58_vm0, %v43_v7  ;;  %143 = vmatpush.msra.mxu2 %v116_v12  ;;  %v129_v22 = vld [vmem:[#allocation2 + $0xc8] sm:$0xff]  ;;  %v128_v24 = vld [vmem:[#allocation2 + $0xc0] sm:$0xff]  ;;  %v111_v25 = vld [vmem:[#allocation2 + $0x38] sm:$0xff] }
   0xf   :  { %94 = vmatpush.msrb.mxu1 %v51_v10  ;;  %163 = vmatpush.msra.mxu3 %v132_v14  ;;  %v127_v26 = vld [vmem:[#allocation2 + $0xb8] sm:$0xff]  ;;  %v110_v27 = vld [vmem:[#allocation2 + $0x30] sm:$0xff]  ;;  %v109_v28 = vld [vmem:[#allocation2 + $0x28] sm:$0xff] }
  0x10   :  { %144 = vmatpush.msra.mxu2 %v115_v15  ;;  %v108_v29 = vld [vmem:[#allocation2 + $0x20] sm:$0xff]  ;;  %v107_v30 = vld [vmem:[#allocation2 + $0x18] sm:$0xff]  ;;  %v106_v31 = vld [vmem:[#allocation2 + $0x10] sm:$0xff] }
  0x11   :  { %95 = vmatpush.msrb.mxu1 %v49_v13  ;;  %164 = vmatpush.msra.mxu3 %v131_v17  ;;  %v126_v32 = vld [vmem:[#allocation2 + $0xb0] sm:$0xff]  ;;  %v105_v33 = vld [vmem:[#allocation2 + $0x8] sm:$0xff]  ;;  %v104_v35 = vld [vmem:[#allocation2] sm:$0xff] }
  0x12   :  { %145 = vmatpush.msra.mxu2 %v114_v18  ;;  %v125_v34 = vld [vmem:[#allocation2 + $0xa8] sm:$0xff]  ;;  %v124_v36 = vld [vmem:[#allocation2 + $0xa0] sm:$0xff]  ;;  %v123_v37 = vld [vmem:[#allocation2 + $0x98] sm:$0xff] }
  0x13   :  { %96 = vmatpush.msrb.mxu1 %v47_v16  ;;  %165 = vmatpush.msra.mxu3 %v130_v20  ;;  %v122_v38 = vld [vmem:[#allocation2 + $0x90] sm:$0xff]  ;;  %v121_v39 = vld [vmem:[#allocation2 + $0x88] sm:$0xff]  ;;  %v120_v40 = vld [vmem:[#allocation2 + $0x80] sm:$0xff] }
  0x14   :  { %146 = vmatpush.msra.mxu2 %v113_v21  ;;  %v196_v41 = vld [vmem:[%s441_s5 + $0x78] sm:$0xff]  ;;  %v195_v42 = vld [vmem:[%s441_s5 + $0x70] sm:$0xff]  ;;  %v194_v43 = vld [vmem:[%s441_s5 + $0x68] sm:$0xff] }
  0x15   :  { %97 = vmatpush.msrb.mxu1 %v45_v19  ;;  %166 = vmatpush.msra.mxu3 %v129_v22  ;;  %v193_v44 = vld [vmem:[%s441_s5 + $0x60] sm:$0xff]  ;;  %v192_v45 = vld [vmem:[%s441_s5 + $0x58] sm:$0xff]  ;;  %v191_v46 = vld [vmem:[%s441_s5 + $0x50] sm:$0xff] }
  0x16   :  { %241 = vmatmul.msk.f32.vlgmr.msrb.gmra.mxu1 %vm58_vm0, %v43_v7  ;;  %147 = vmatpush.msra.mxu2 %v112_v23  ;;  %v190_v47 = vld [vmem:[%s441_s5 + $0x48] sm:$0xff]  ;;  %v189_v48 = vld [vmem:[%s441_s5 + $0x40] sm:$0xff]  ;;  %v188_v50 = vld [vmem:[%s441_s5 + $0x38] sm:$0xff] }
  0x17   :  { %167 = vmatpush.msra.mxu3 %v128_v24  ;;  %201 = vmatpush.msra.mxu0 %v196_v41  ;;  %v52_v49 = vld [vmem:[%s438_s2] sm:$0x3]  ;;  %v187_v59 = vld [vmem:[%s441_s5 + $0x30] sm:$0xff]  ;;  %v186_v60 = vld [vmem:[%s441_s5 + $0x28] sm:$0xff] }
  0x18   :  { %148 = vmatpush.msra.mxu2 %v111_v25  ;;  %v54_v51 = vperm.slane %v52_v49, 0  ;;  %v55_v55 = vperm.slane %v52_v49, 1  ;;  %v185_v61 = vld [vmem:[%s441_s5 + $0x20] sm:$0xff]  ;;  %v184_v62 = vld [vmem:[%s441_s5 + $0x18] sm:$0xff]  ;;  %v183_v63 = vld [vmem:[%s441_s5 + $0x10] sm:$0xff] }
  0x19   :  { %168 = vmatpush.msra.mxu3 %v127_v26  ;;  %202 = vmatpush.msra.mxu0 %v195_v42  ;;  %v182_v0 = vld [vmem:[%s441_s5 + $0x8] sm:$0xff]  ;;  %v181_v1 = vld [vmem:[%s441_s5] sm:$0xff]  ;;  %s230_s5 = sshll.u32 %s443_s7, 4  ;;  %s231_s5 = int_to_ptr.hbm [resolvable:$true] %s230_s5 }
  0x1a   :  { %149 = vmatpush.msra.mxu2 %v110_v27  ;;  %v246_v2 = vld [vmem:[%s440_s4] ss:$0 sm:$0xff] }
  0x1b   :  { %169 = vmatpush.msra.mxu3 %v126_v32  ;;  %203 = vmatpush.msra.mxu0 %v194_v43  ;;  %v247_v8 = vld [vmem:[%s442_s6] ss:$0 sm:$0xff] }
  0x1c   :  { %150 = vmatpush.msra.mxu2 %v109_v28 }
  0x1d   :  { %170 = vmatpush.msra.mxu3 %v125_v34  ;;  %204 = vmatpush.msra.mxu0 %v193_v44 }
  0x1e   :  { %151 = vmatpush.msra.mxu2 %v108_v29 }
  0x1f   :  { %171 = vmatpush.msra.mxu3 %v124_v36  ;;  %205 = vmatpush.msra.mxu0 %v192_v45 }
  0x20   :  { %152 = vmatpush.msra.mxu2 %v107_v30 }
  0x21   :  { %172 = vmatpush.msra.mxu3 %v123_v37  ;;  %206 = vmatpush.msra.mxu0 %v191_v46 }
  0x22   :  { %153 = vmatpush.msra.mxu2 %v106_v31 }
  0x23   :  { %173 = vmatpush.msra.mxu3 %v122_v38  ;;  %207 = vmatpush.msra.mxu0 %v190_v47 }
  0x24   :  { %154 = vmatpush.msra.mxu2 %v105_v33 }
  0x25   :  { %174 = vmatpush.msra.mxu3 %v121_v39  ;;  %208 = vmatpush.msra.mxu0 %v189_v48 }
  0x26   :  { %155 = vmatpush.msra.mxu2 %v104_v35 }
  0x27   :  { %175 = vmatpush.msra.mxu3 %v120_v40  ;;  %209 = vmatpush.msra.mxu0 %v188_v50 }
  0x29   :  { %210 = vmatpush.msra.mxu0 %v187_v59 }
  0x2b   :  { %211 = vmatpush.msra.mxu0 %v186_v60 }
  0x2d   :  { %212 = vmatpush.msra.mxu0 %v185_v61 }
  0x2f   :  { %213 = vmatpush.msra.mxu0 %v184_v62 }
  0x31   :  { %214 = vmatpush.msra.mxu0 %v183_v63 }
  0x33   :  { %215 = vmatpush.msra.mxu0 %v182_v0 }
  0x35   :  { %216 = vmatpush.msra.mxu0 %v181_v1 }
  0x8b   :  { %v79_v52 = vpop.f32.mrf.mxu1 }
  0x8c   :  { %v80_v53 = vadd.f32 %v79_v52, %v54_v51 }
  0x8e   :  { %v102_v54 = vmax.f32 %v80_v53, 0.0 }
  0x90   :  { %156 = vmatmul.f32.vlgmr.msra.gmra.mxu2 %v102_v54 }
  0x93   :  { %v99_v56 = vpop.f32.mrf.mxu1 }
  0x94   :  { %v100_v57 = vadd.f32 %v99_v56, %v55_v55 }
  0x96   :  { %v103_v58 = vmax.f32 %v100_v57, 0.0 }
  0x98   :  { %176 = vmatmul.f32.vlgmr.msra.gmra.mxu3 %v103_v58 }
 0x113   :  { %v157_v3 = vpop.f32.mrf.mxu2 }
 0x114   :  { %v158_v4 = vadd.f32 %v246_v2, %v157_v3 }
 0x11b   :  { %v177_v5 = vpop.f32.mrf.mxu3 }
 0x11c   :  { %v178_v6 = vadd.f32 %v177_v5, %v158_v4 }
 0x11e   :  { %v180_v7 = vmax.f32 %v178_v6, 0.0 }
 0x120   :  { %217 = vmatmul.f32.vlgmr.msra.gmra.mxu0 %v180_v7 }
 0x19d   :  { %v218_v9 = vpop.f32.mrf.mxu0 }
 0x19e   :  { %v219_v10 = vadd.f32 %v247_v8, %v218_v9 }
 0x1a0   :  { %222 = vst.msk [vmem:[#allocation5] sm:$0xff] %vm221_vm1, %v219_v10 }
 0x1a1   :  { %233 = dma.vmem_to_hbm [thread:$0]  %s229_s12, 128, %s231_s5, [#allocation4]  }
 0x1a2   :  { %298 = dma.done.wait [#allocation4], 128  }
 0x1a3   :  { %299 = vsyncadd [#allocation4], 4294967168 }
 0x1a4   :  { %238 = vsyncpa [#allocation3], 1 }
 0x1a5   :  { %239 = vsyncpa [#allocation4], 1 }

// kernel: tpu_custom_call.1
= control target key start
LH: loop header
LB: loop body
LE: loop exit
PB: predicated region body
PF: predicated region fallthrough
CT: control target
= control target key end

     0   :  { %12 = vsyncpa [#allocation3], 0  ;;  %s436_s0 = inlined_call_operand.vmem [shape: f32[8,32], index: 0, kind: input, shape index: {}]   ;;  %s437_s1 = inlined_call_operand.vmem [shape: f32[32,256], index: 1, kind: input, shape index: {}]   ;;  %s438_s2 = inlined_call_operand.vmem [shape: f32[1,256], index: 2, kind: input, shape index: {}]   ;;  %s439_s3 = inlined_call_operand.hbm [shape: f32[256,128], index: 3, kind: input, shape index: {}]   ;;  %s440_s4 = inlined_call_operand.vmem [shape: f32[1,128], index: 4, kind: input, shape index: {}]   ;;  %s441_s5 = inlined_call_operand.vmem [shape: f32[128,8], index: 5, kind: input, shape index: {}]   ;;  %s442_s6 = inlined_call_operand.vmem [shape: f32[1,8], index: 6, kind: input, shape index: {}]   ;;  %s443_s7 = inlined_call_operand.hbm [shape: f32[8,8], index: 7, kind: output, shape index: {}]  }
   0x1   :  { %13 = vsyncpa [#allocation4], 0  ;;  %s24_s26 = sshll.u32 %s439_s3, 4  ;;  %s300_s27 = smov [#allocation2]   ;;  %s25_s26 = int_to_ptr.hbm [resolvable:$true] %s24_s26 }
   0x2   :  { %s26_s28 = sshll.u32 %s300_s27, 4  ;;  %s301_s29 = smov 128   ;;  %s27_s28 = int_to_ptr.vmem [resolvable:$true] %s26_s28 }
   0x3   :  { %s302_s30 = smov 8  }
   0x4   :  { %32 = dma.hbm_to_vmem [thread:$0]  %s25_s26, 4096, %s27_s28, [#allocation3], %s301_s29, %s301_s29, %s302_s30  }
   0x5   :  { %296 = dma.done.wait [#allocation3], 4096  }
   0x6   :  { %297 = vsyncadd [#allocation3], 4294963200  ;;  %v50_v0 = vld [vmem:[%s437_s1 + $0x30] sm:$0xff]  ;;  %v48_v1 = vld [vmem:[%s437_s1 + $0x20] sm:$0xff]  ;;  %vm58_vm0 = vcmask 261120   ;;  %s303_s11 = smov [#allocation5]  }
   0x7   :  { %74 = vmatpush.msra.mxu1 %v50_v0  ;;  %v46_v2 = vld [vmem:[%s437_s1 + $0x10] sm:$0xff]  ;;  %v119_v3 = vld [vmem:[#allocation2 + $0x78] sm:$0xff]  ;;  %v44_v5 = vld [vmem:[%s437_s1] sm:$0xff]  ;;  %s228_s12 = sshll.u32 %s303_s11, 4  ;;  %vm221_vm1 = vcmask 64512   ;;  %s229_s12 = int_to_ptr.vmem [resolvable:$true] %s228_s12 }
   0x8   :  { %v118_v4 = vld [vmem:[#allocation2 + $0x70] sm:$0xff]  ;;  %140 = vmatpush.msra.mxu2 %v119_v3  ;;  %v135_v6 = vld [vmem:[#allocation2 + $0xf8] sm:$0xff]  ;;  %v43_v7 = vld [vmem:[%s436_s0] sm:$0xff] }
   0x9   :  { %75 = vmatpush.msra.mxu1 %v48_v1  ;;  %v117_v8 = vld [vmem:[#allocation2 + $0x68] sm:$0xff]  ;;  %160 = vmatpush.msra.mxu3 %v135_v6  ;;  %v134_v9 = vld [vmem:[#allocation2 + $0xf0] sm:$0xff]  ;;  %v51_v10 = vld [vmem:[%s437_s1 + $0x38] sm:$0xff] }
   0xa   :  { %141 = vmatpush.msra.mxu2 %v118_v4  ;;  %v133_v11 = vld [vmem:[#allocation2 + $0xe8] sm:$0xff]  ;;  %v116_v12 = vld [vmem:[#allocation2 + $0x60] sm:$0xff]  ;;  %v115_v15 = vld [vmem:[#allocation2 + $0x58] sm:$0xff] }
   0xb   :  { %76 = vmatpush.msra.mxu1 %v46_v2  ;;  %161 = vmatpush.msra.mxu3 %v134_v9  ;;  %v49_v13 = vld [vmem:[%s437_s1 + $0x28] sm:$0xff]  ;;  %v132_v14 = vld [vmem:[#allocation2 + $0xe0] sm:$0xff]  ;;  %v47_v16 = vld [vmem:[%s437_s1 + $0x18] sm:$0xff] }
   0xc   :  { %142 = vmatpush.msra.mxu2 %v117_v8  ;;  %v131_v17 = vld [vmem:[#allocation2 + $0xd8] sm:$0xff]  ;;  %v114_v18 = vld [vmem:[#allocation2 + $0x50] sm:$0xff]  ;;  %v45_v19 = vld [vmem:[%s437_s1 + $0x8] sm:$0xff] }
   0xd   :  { %77 = vmatpush.msra.mxu1 %v44_v5  ;;  %162 = vmatpush.msra.mxu3 %v133_v11  ;;  %v130_v20 = vld [vmem:[#allocation2 + $0xd0] sm:$0xff]  ;;  %v113_v21 = vld [vmem:[#allocation2 + $0x48] sm:$0xff]  ;;  %v112_v23 = vld [vmem:[#allocation2 + $0x40] sm:$0xff] }
   0xe   :  { %240 = vmatmul.msk.f32.vlgmr.msra.gmra.mxu1 %vm58_vm0, %v43_v7  ;;  %143 = vmatpush.msra.mxu2 %v116_v12  ;;  %v129_v22 = vld [vmem:[#allocation2 + $0xc8] sm:$0xff]  ;;  %v128_v24 = vld [vmem:[#allocation2 + $0xc0] sm:$0xff]  ;;  %v111_v25 = vld [vmem:[#allocation2 + $0x38] sm:$0xff] }
   0xf   :  { %94 = vmatpush.msrb.mxu1 %v51_v10  ;;  %163 = vmatpush.msra.mxu3 %v132_v14  ;;  %v127_v26 = vld [vmem:[#allocation2 + $0xb8] sm:$0xff]  ;;  %v110_v27 = vld [vmem:[#allocation2 + $0x30] sm:$0xff]  ;;  %v109_v28 = vld [vmem:[#allocation2 + $0x28] sm:$0xff] }
  0x10   :  { %144 = vmatpush.msra.mxu2 %v115_v15  ;;  %v108_v29 = vld [vmem:[#allocation2 + $0x20] sm:$0xff]  ;;  %v107_v30 = vld [vmem:[#allocation2 + $0x18] sm:$0xff]  ;;  %v106_v31 = vld [vmem:[#allocation2 + $0x10] sm:$0xff] }
  0x11   :  { %95 = vmatpush.msrb.mxu1 %v49_v13  ;;  %164 = vmatpush.msra.mxu3 %v131_v17  ;;  %v126_v32 = vld [vmem:[#allocation2 + $0xb0] sm:$0xff]  ;;  %v105_v33 = vld [vmem:[#allocation2 + $0x8] sm:$0xff]  ;;  %v104_v35 = vld [vmem:[#allocation2] sm:$0xff] }
  0x12   :  { %145 = vmatpush.msra.mxu2 %v114_v18  ;;  %v125_v34 = vld [vmem:[#allocation2 + $0xa8] sm:$0xff]  ;;  %v124_v36 = vld [vmem:[#allocation2 + $0xa0] sm:$0xff]  ;;  %v123_v37 = vld [vmem:[#allocation2 + $0x98] sm:$0xff] }
  0x13   :  { %96 = vmatpush.msrb.mxu1 %v47_v16  ;;  %165 = vmatpush.msra.mxu3 %v130_v20  ;;  %v122_v38 = vld [vmem:[#allocation2 + $0x90] sm:$0xff]  ;;  %v121_v39 = vld [vmem:[#allocation2 + $0x88] sm:$0xff]  ;;  %v120_v40 = vld [vmem:[#allocation2 + $0x80] sm:$0xff] }
  0x14   :  { %146 = vmatpush.msra.mxu2 %v113_v21  ;;  %v196_v41 = vld [vmem:[%s441_s5 + $0x78] sm:$0xff]  ;;  %v195_v42 = vld [vmem:[%s441_s5 + $0x70] sm:$0xff]  ;;  %v194_v43 = vld [vmem:[%s441_s5 + $0x68] sm:$0xff] }
  0x15   :  { %97 = vmatpush.msrb.mxu1 %v45_v19  ;;  %166 = vmatpush.msra.mxu3 %v129_v22  ;;  %v193_v44 = vld [vmem:[%s441_s5 + $0x60] sm:$0xff]  ;;  %v192_v45 = vld [vmem:[%s441_s5 + $0x58] sm:$0xff]  ;;  %v191_v46 = vld [vmem:[%s441_s5 + $0x50] sm:$0xff] }
  0x16   :  { %241 = vmatmul.msk.f32.vlgmr.msrb.gmra.mxu1 %vm58_vm0, %v43_v7  ;;  %147 = vmatpush.msra.mxu2 %v112_v23  ;;  %v190_v47 = vld [vmem:[%s441_s5 + $0x48] sm:$0xff]  ;;  %v189_v48 = vld [vmem:[%s441_s5 + $0x40] sm:$0xff]  ;;  %v188_v50 = vld [vmem:[%s441_s5 + $0x38] sm:$0xff] }
  0x17   :  { %167 = vmatpush.msra.mxu3 %v128_v24  ;;  %201 = vmatpush.msra.mxu0 %v196_v41  ;;  %v52_v49 = vld [vmem:[%s438_s2] sm:$0x3]  ;;  %v187_v59 = vld [vmem:[%s441_s5 + $0x30] sm:$0xff]  ;;  %v186_v60 = vld [vmem:[%s441_s5 + $0x28] sm:$0xff] }
  0x18   :  { %148 = vmatpush.msra.mxu2 %v111_v25  ;;  %v54_v51 = vperm.slane %v52_v49, 0  ;;  %v55_v55 = vperm.slane %v52_v49, 1  ;;  %v185_v61 = vld [vmem:[%s441_s5 + $0x20] sm:$0xff]  ;;  %v184_v62 = vld [vmem:[%s441_s5 + $0x18] sm:$0xff]  ;;  %v183_v63 = vld [vmem:[%s441_s5 + $0x10] sm:$0xff] }
  0x19   :  { %168 = vmatpush.msra.mxu3 %v127_v26  ;;  %202 = vmatpush.msra.mxu0 %v195_v42  ;;  %v182_v0 = vld [vmem:[%s441_s5 + $0x8] sm:$0xff]  ;;  %v181_v1 = vld [vmem:[%s441_s5] sm:$0xff]  ;;  %s230_s5 = sshll.u32 %s443_s7, 4  ;;  %s231_s5 = int_to_ptr.hbm [resolvable:$true] %s230_s5 }
  0x1a   :  { %149 = vmatpush.msra.mxu2 %v110_v27  ;;  %v246_v2 = vld [vmem:[%s440_s4] ss:$0 sm:$0xff] }
  0x1b   :  { %169 = vmatpush.msra.mxu3 %v126_v32  ;;  %203 = vmatpush.msra.mxu0 %v194_v43  ;;  %v247_v8 = vld [vmem:[%s442_s6] ss:$0 sm:$0xff] }
  0x1c   :  { %150 = vmatpush.msra.mxu2 %v109_v28 }
  0x1d   :  { %170 = vmatpush.msra.mxu3 %v125_v34  ;;  %204 = vmatpush.msra.mxu0 %v193_v44 }
  0x1e   :  { %151 = vmatpush.msra.mxu2 %v108_v29 }
  0x1f   :  { %171 = vmatpush.msra.mxu3 %v124_v36  ;;  %205 = vmatpush.msra.mxu0 %v192_v45 }
  0x20   :  { %152 = vmatpush.msra.mxu2 %v107_v30 }
  0x21   :  { %172 = vmatpush.msra.mxu3 %v123_v37  ;;  %206 = vmatpush.msra.mxu0 %v191_v46 }
  0x22   :  { %153 = vmatpush.msra.mxu2 %v106_v31 }
  0x23   :  { %173 = vmatpush.msra.mxu3 %v122_v38  ;;  %207 = vmatpush.msra.mxu0 %v190_v47 }
  0x24   :  { %154 = vmatpush.msra.mxu2 %v105_v33 }
  0x25   :  { %174 = vmatpush.msra.mxu3 %v121_v39  ;;  %208 = vmatpush.msra.mxu0 %v189_v48 }
  0x26   :  { %155 = vmatpush.msra.mxu2 %v104_v35 }
  0x27   :  { %175 = vmatpush.msra.mxu3 %v120_v40  ;;  %209 = vmatpush.msra.mxu0 %v188_v50 }
  0x29   :  { %210 = vmatpush.msra.mxu0 %v187_v59 }
  0x2b   :  { %211 = vmatpush.msra.mxu0 %v186_v60 }
  0x2d   :  { %212 = vmatpush.msra.mxu0 %v185_v61 }
  0x2f   :  { %213 = vmatpush.msra.mxu0 %v184_v62 }
  0x31   :  { %214 = vmatpush.msra.mxu0 %v183_v63 }
  0x33   :  { %215 = vmatpush.msra.mxu0 %v182_v0 }
  0x35   :  { %216 = vmatpush.msra.mxu0 %v181_v1 }
  0x8b   :  { %v79_v52 = vpop.f32.mrf.mxu1 }
  0x8c   :  { %v80_v53 = vadd.f32 %v79_v52, %v54_v51 }
  0x8e   :  { %v102_v54 = vmax.f32 %v80_v53, 0.0 }
  0x90   :  { %156 = vmatmul.f32.vlgmr.msra.gmra.mxu2 %v102_v54 }
  0x93   :  { %v99_v56 = vpop.f32.mrf.mxu1 }
  0x94   :  { %v100_v57 = vadd.f32 %v99_v56, %v55_v55 }
  0x96   :  { %v103_v58 = vmax.f32 %v100_v57, 0.0 }
  0x98   :  { %176 = vmatmul.f32.vlgmr.msra.gmra.mxu3 %v103_v58 }
 0x113   :  { %v157_v3 = vpop.f32.mrf.mxu2 }
 0x114   :  { %v158_v4 = vadd.f32 %v246_v2, %v157_v3 }
 0x11b   :  { %v177_v5 = vpop.f32.mrf.mxu3 }
 0x11c   :  { %v178_v6 = vadd.f32 %v177_v5, %v158_v4 }
 0x11e   :  { %v180_v7 = vmax.f32 %v178_v6, 0.0 }
 0x120   :  { %217 = vmatmul.f32.vlgmr.msra.gmra.mxu0 %v180_v7 }
 0x19d   :  { %v218_v9 = vpop.f32.mrf.mxu0 }
 0x19e   :  { %v219_v10 = vadd.f32 %v247_v8, %v218_v9 }
 0x1a0   :  { %222 = vst.msk [vmem:[#allocation5] sm:$0xff] %vm221_vm1, %v219_v10 }
 0x1a1   :  { %233 = dma.vmem_to_hbm [thread:$0]  %s229_s12, 128, %s231_s5, [#allocation4]  }
 0x1a2   :  { %298 = dma.done.wait [#allocation4], 128  }
 0x1a3   :  { %299 = vsyncadd [#allocation4], 4294967168 }
 0x1a4   :  { %238 = vsyncpa [#allocation3], 1 }
 0x1a5   :  { %239 = vsyncpa [#allocation4], 1 }

</bundles_post_ra>
